<compile_context>
chip_gen: v5e
topology: v5e:2x2
jax: 0.10.0
libtpu: 0.0.40
codegen_flags: <defaults>
</compile_context>

<pallas_src>
import functools

import jax
import jax.numpy as jnp
from jax import lax
from jax.experimental import pallas as pl
from jax.experimental.pallas import tpu as pltpu


# ----------------------------- fused kernel ----------------------------------
def _fused_xattn_kernel(x1_ref, x2_ref, wq_ref, bq_ref, wkv_ref, bkv_ref,
                        wo_ref, bo_ref, out_ref, *, num_heads, head_dim):
    """One (batch, q-tile) step of cross attention.

    x1: (tq, D) query-side rows, x2: (L2, D) key/value-side rows.
    wq: (D, D) with the 1/sqrt(hd) scale pre-folded; wkv = [wk | wv]: (D, 2D);
    wo: (D, D).  All matmuls accumulate in f32 via preferred_element_type.
    """
    dim = num_heads * head_dim
    in_dtype = x1_ref.dtype

    x1 = x1_ref[...]
    x2 = x2_ref[...]

    # Projections (scale already folded into wq/bq by the wrapper).
    q = (jnp.dot(x1, wq_ref[...], preferred_element_type=jnp.float32)
         + bq_ref[...]).astype(in_dtype)                                 # (tq, D)
    kv = (jnp.dot(x2, wkv_ref[...], preferred_element_type=jnp.float32)
          + bkv_ref[...]).astype(in_dtype)                               # (L2, 2D)
    k = kv[:, :dim]
    v = kv[:, dim:]

    # Per-head attention (unrolled at trace time; H is small).
    o_heads = []
    for h in range(num_heads):
        sl = slice(h * head_dim, (h + 1) * head_dim)
        qh = q[:, sl]                                                    # (tq, hd)
        kh = k[:, sl]                                                    # (L2, hd)
        vh = v[:, sl]                                                    # (L2, hd)

        # scores = q @ k^T without materializing the transpose.
        s = lax.dot_general(qh, kh, dimension_numbers=(((1,), (1,)), ((), ())),
                            preferred_element_type=jnp.float32)          # (tq, L2)
        # Numerically stable softmax, f32 stats, exact normalization.
        s = s - jnp.max(s, axis=-1, keepdims=True)
        p = jnp.exp(s)
        p = p * (1.0 / jnp.sum(p, axis=-1, keepdims=True))
        # TODO(synk): attention dropout would be applied to p here in training.

        o_heads.append(jnp.dot(p.astype(in_dtype), vh,
                               preferred_element_type=jnp.float32))       # (tq, hd)

    # One dense output projection over the concatenated heads.
    o = jnp.concatenate(o_heads, axis=-1)                                 # (tq, D)
    out = jnp.dot(o.astype(wo_ref.dtype), wo_ref[...],
                  preferred_element_type=jnp.float32) + bo_ref[...]       # (tq, D)
    out_ref[...] = out.astype(out_ref.dtype)


# ----------------------------- wrapper ----------------------------------------
def standard_cross_attention(seq1, seq2, params, *, num_heads, q_tile=128):
    """seq1: [B, L1, D], seq2: [B, L2, D] -> [B, L1, D] (eval-mode forward)."""
    B, L1, D = seq1.shape
    _, L2, _ = seq2.shape
    assert D % num_heads == 0
    hd = D // num_heads
    scale = hd ** (-0.5)

    wq, bq, wk, bk, wv, bv, wo, bo = params

    # One-time parameter prep (outside the kernel):
    #   * fold the attention scale into the Q projection,
    #   * fuse the K and V projection weights into a single (D, 2D) matmul.
    dt = seq1.dtype
    wq_s = (wq * scale).astype(dt)
    bq_s = (bq * scale).reshape(1, D).astype(dt)
    wkv = jnp.concatenate([wk, wv], axis=1).astype(dt)                  # (D, 2D)
    bkv = jnp.concatenate([bk, bv]).reshape(1, 2 * D).astype(dt)        # (1, 2D)
    wo_c = wo.astype(dt)
    bo2 = bo.reshape(1, D).astype(dt)

    tq = min(q_tile, L1)
    assert L1 % tq == 0, "demo requires L1 divisible by the query tile"
    n_q = L1 // tq

    kernel = functools.partial(_fused_xattn_kernel,
                               num_heads=num_heads, head_dim=hd)

    return pl.pallas_call(
        kernel,
        out_shape=jax.ShapeDtypeStruct((B, L1, D), seq1.dtype),
        grid_spec=pltpu.PrefetchScalarGridSpec(
            num_scalar_prefetch=0,
            grid=(B, n_q),
            in_specs=[
                pl.BlockSpec((None, tq, D), lambda b, qi: (b, qi, 0)),   # x1 tile
                pl.BlockSpec((None, L2, D), lambda b, qi: (b, 0, 0)),    # x2 (full L2)
                pl.BlockSpec((D, D), lambda b, qi: (0, 0)),              # wq (scaled)
                pl.BlockSpec((1, D), lambda b, qi: (0, 0)),              # bq (scaled)
                pl.BlockSpec((D, 2 * D), lambda b, qi: (0, 0)),          # wkv
                pl.BlockSpec((1, 2 * D), lambda b, qi: (0, 0)),          # bkv
                pl.BlockSpec((D, D), lambda b, qi: (0, 0)),              # wo
                pl.BlockSpec((1, D), lambda b, qi: (0, 0)),              # bo
            ],
            out_specs=pl.BlockSpec((None, tq, D), lambda b, qi: (b, qi, 0)),
        ),
        compiler_params=pltpu.CompilerParams(
            dimension_semantics=("parallel", "parallel")),
    )(seq1, seq2, wq_s, bq_s, wkv, bkv, wo_c, bo2)


# ----------------------------- reference ---------------------------------------
def _reference(seq1, seq2, params, *, num_heads):
    """Pure-JAX reference matching the PyTorch forward (eval mode).

    Uses Precision.HIGHEST so the reference is accurate f32 regardless of the
    backend's default matmul precision (TPU DEFAULT would otherwise be bf16).
    """
    B, L1, D = seq1.shape
    _, L2, _ = seq2.shape
    hd = D // num_heads
    scale = hd ** (-0.5)
    hp = jax.lax.Precision.HIGHEST
    wq, bq, wk, bk, wv, bv, wo, bo = params
    q = jnp.dot(seq1, wq, precision=hp) + bq
    k = jnp.dot(seq2, wk, precision=hp) + bk
    v = jnp.dot(seq2, wv, precision=hp) + bv
    q = q.reshape(B, L1, num_heads, hd).transpose(0, 2, 1, 3)
    k = k.reshape(B, L2, num_heads, hd).transpose(0, 2, 1, 3)
    v = v.reshape(B, L2, num_heads, hd).transpose(0, 2, 1, 3)
    s = jnp.einsum("bhqd,bhkd->bhqk", q, k, precision=hp) * scale
    p = jax.nn.softmax(s, axis=-1)
    o = jnp.einsum("bhqk,bhkd->bhqd", p, v, precision=hp)
    o = o.transpose(0, 2, 1, 3).reshape(B, L1, D)
    return jnp.dot(o, wo, precision=hp) + bo


if __name__ == "__main__":
    # D=128 keeps projections, scores and the output store lane-dense; hd = 32.
    B, L1, L2, D, H = 2, 8, 16, 128, 4

    key = jax.random.PRNGKey(0)
    keys = jax.random.split(key, 10)
    seq1 = jax.random.normal(keys[0], (B, L1, D), dtype=jnp.float32)
    seq2 = jax.random.normal(keys[1], (B, L2, D), dtype=jnp.float32)

    init = 1.0 / jnp.sqrt(jnp.float32(D))
    params = (
        jax.random.normal(keys[2], (D, D), jnp.float32) * init,  # wq
        jax.random.normal(keys[3], (D,), jnp.float32) * 0.01,    # bq
        jax.random.normal(keys[4], (D, D), jnp.float32) * init,  # wk
        jax.random.normal(keys[5], (D,), jnp.float32) * 0.01,    # bk
        jax.random.normal(keys[6], (D, D), jnp.float32) * init,  # wv
        jax.random.normal(keys[7], (D,), jnp.float32) * 0.01,    # bv
        jax.random.normal(keys[8], (D, D), jnp.float32) * init,  # wo
        jax.random.normal(keys[9], (D,), jnp.float32) * 0.01,    # bo
    )

    out = standard_cross_attention(seq1, seq2, params, num_heads=H)
    out = jax.block_until_ready(out)

    ref = _reference(seq1, seq2, params, num_heads=H)
    assert out.shape == (B, L1, D)
    assert jnp.allclose(out, ref, atol=2e-3, rtol=2e-3), "mismatch vs reference"

    print("KERNEL_OK")
</pallas_src>

<mosaic_0001>
module attributes {stable_mosaic.version = 11 : i64} {
  func.func @_fused_xattn_kernel(%arg0: i32, %arg1: i32, %arg2: memref<1x8x128xf32, #tpu.memory_space<vmem>>, %arg3: memref<1x16x128xf32, #tpu.memory_space<vmem>>, %arg4: memref<128x128xf32, #tpu.memory_space<vmem>>, %arg5: memref<1x128xf32, #tpu.memory_space<vmem>>, %arg6: memref<128x256xf32, #tpu.memory_space<vmem>>, %arg7: memref<1x256xf32, #tpu.memory_space<vmem>>, %arg8: memref<128x128xf32, #tpu.memory_space<vmem>>, %arg9: memref<1x128xf32, #tpu.memory_space<vmem>>, %arg10: memref<1x8x128xf32, #tpu.memory_space<vmem>>) attributes {dimension_semantics = [#tpu.dimension_semantics<parallel>, #tpu.dimension_semantics<parallel>], iteration_bounds = array<i64: 2, 1>, scalar_prefetch = 0 : i64, scratch_operands = 0 : i64, tpu.core_type = #tpu.core_type<tc>, window_params = [{transform_indices = @transform_0, window_bounds = array<i64: 1, 8, 128>}, {transform_indices = @transform_1, window_bounds = array<i64: 1, 16, 128>}, {pipeline_mode = #tpu.pipeline_mode<synchronous>, transform_indices = @transform_2, window_bounds = array<i64: 128, 128>}, {pipeline_mode = #tpu.pipeline_mode<synchronous>, transform_indices = @transform_3, window_bounds = array<i64: 1, 128>}, {pipeline_mode = #tpu.pipeline_mode<synchronous>, transform_indices = @transform_4, window_bounds = array<i64: 128, 256>}, {pipeline_mode = #tpu.pipeline_mode<synchronous>, transform_indices = @transform_5, window_bounds = array<i64: 1, 256>}, {pipeline_mode = #tpu.pipeline_mode<synchronous>, transform_indices = @transform_6, window_bounds = array<i64: 128, 128>}, {pipeline_mode = #tpu.pipeline_mode<synchronous>, transform_indices = @transform_7, window_bounds = array<i64: 1, 128>}, {transform_indices = @transform_8, window_bounds = array<i64: 1, 8, 128>}]} {
    %c0 = arith.constant 0 : index
    %c0_0 = arith.constant 0 : index
    %c0_1 = arith.constant 0 : index
    %0 = vector.load %arg2[%c0, %c0_0, %c0_1] : memref<1x8x128xf32, #tpu.memory_space<vmem>>, vector<1x8x128xf32>
    %1 = vector.shape_cast %0 : vector<1x8x128xf32> to vector<8x128xf32>
    %c0_2 = arith.constant 0 : index
    %c0_3 = arith.constant 0 : index
    %c0_4 = arith.constant 0 : index
    %2 = vector.load %arg3[%c0_2, %c0_3, %c0_4] : memref<1x16x128xf32, #tpu.memory_space<vmem>>, vector<1x16x128xf32>
    %3 = vector.shape_cast %2 : vector<1x16x128xf32> to vector<16x128xf32>
    %c0_5 = arith.constant 0 : index
    %c0_6 = arith.constant 0 : index
    %4 = vector.load %arg4[%c0_5, %c0_6] : memref<128x128xf32, #tpu.memory_space<vmem>>, vector<128x128xf32>
    %cst = arith.constant dense<0.000000e+00> : vector<8x128xf32>
    %5 = tpu.matmul %1, %4, %cst {dimension_numbers = #tpu.dot_dimension_numbers<[1], [0], [0], [1], [0, 0, 1, 1], [], []>} : vector<8x128xf32>, vector<128x128xf32>, vector<8x128xf32> -> vector<8x128xf32>
    %c0_7 = arith.constant 0 : index
    %c0_8 = arith.constant 0 : index
    %6 = vector.load %arg5[%c0_7, %c0_8] : memref<1x128xf32, #tpu.memory_space<vmem>>, vector<1x128xf32>
    %7 = vector.broadcast %6 : vector<1x128xf32> to vector<8x128xf32>
    %8 = arith.addf %5, %7 : vector<8x128xf32>
    %c0_9 = arith.constant 0 : index
    %c0_10 = arith.constant 0 : index
    %9 = vector.load %arg6[%c0_9, %c0_10] : memref<128x256xf32, #tpu.memory_space<vmem>>, vector<128x256xf32>
    %cst_11 = arith.constant dense<0.000000e+00> : vector<16x256xf32>
    %10 = tpu.matmul %3, %9, %cst_11 {dimension_numbers = #tpu.dot_dimension_numbers<[1], [0], [0], [1], [0, 0, 1, 1], [], []>} : vector<16x128xf32>, vector<128x256xf32>, vector<16x256xf32> -> vector<16x256xf32>
    %c0_12 = arith.constant 0 : index
    %c0_13 = arith.constant 0 : index
    %11 = vector.load %arg7[%c0_12, %c0_13] : memref<1x256xf32, #tpu.memory_space<vmem>>, vector<1x256xf32>
    %12 = vector.broadcast %11 : vector<1x256xf32> to vector<16x256xf32>
    %13 = arith.addf %10, %12 : vector<16x256xf32>
    %14 = vector.extract_strided_slice %13 {offsets = [0, 0], sizes = [16, 128], strides = [1, 1]} : vector<16x256xf32> to vector<16x128xf32>
    %15 = vector.extract_strided_slice %13 {offsets = [0, 128], sizes = [16, 128], strides = [1, 1]} : vector<16x256xf32> to vector<16x128xf32>
    %16 = vector.extract_strided_slice %8 {offsets = [0, 0], sizes = [8, 32], strides = [1, 1]} : vector<8x128xf32> to vector<8x32xf32>
    %17 = vector.extract_strided_slice %14 {offsets = [0, 0], sizes = [16, 32], strides = [1, 1]} : vector<16x128xf32> to vector<16x32xf32>
    %18 = vector.extract_strided_slice %15 {offsets = [0, 0], sizes = [16, 32], strides = [1, 1]} : vector<16x128xf32> to vector<16x32xf32>
    %cst_14 = arith.constant dense<0.000000e+00> : vector<8x16xf32>
    %19 = tpu.matmul %16, %17, %cst_14 {dimension_numbers = #tpu.dot_dimension_numbers<[1], [1], [0], [0], [0, 0, 1, 0], [], []>} : vector<8x32xf32>, vector<16x32xf32>, vector<8x16xf32> -> vector<8x16xf32>
    %cst_15 = arith.constant dense<0xFF800000> : vector<8xf32>
    %20 = vector.multi_reduction <maximumf>, %19, %cst_15 [1] : vector<8x16xf32> to vector<8xf32>
    %21 = vector.shape_cast %20 : vector<8xf32> to vector<8x1xf32>
    %22 = vector.broadcast %21 : vector<8x1xf32> to vector<8x16xf32>
    %23 = arith.subf %19, %22 : vector<8x16xf32>
    %24 = math.exp %23 : vector<8x16xf32>
    %cst_16 = arith.constant dense<0.000000e+00> : vector<8xf32>
    %25 = vector.multi_reduction <add>, %24, %cst_16 [1] : vector<8x16xf32> to vector<8xf32>
    %26 = vector.shape_cast %25 : vector<8xf32> to vector<8x1xf32>
    %cst_17 = arith.constant 1.000000e+00 : f32
    %27 = vector.broadcast %cst_17 : f32 to vector<8x1xf32>
    %28 = arith.divf %27, %26 : vector<8x1xf32>
    %29 = vector.broadcast %28 : vector<8x1xf32> to vector<8x16xf32>
    %30 = arith.mulf %24, %29 : vector<8x16xf32>
    %cst_18 = arith.constant dense<0.000000e+00> : vector<8x32xf32>
    %31 = tpu.matmul %30, %18, %cst_18 {dimension_numbers = #tpu.dot_dimension_numbers<[1], [0], [0], [1], [0, 0, 1, 1], [], []>} : vector<8x16xf32>, vector<16x32xf32>, vector<8x32xf32> -> vector<8x32xf32>
    %32 = vector.extract_strided_slice %8 {offsets = [0, 32], sizes = [8, 32], strides = [1, 1]} : vector<8x128xf32> to vector<8x32xf32>
    %33 = vector.extract_strided_slice %14 {offsets = [0, 32], sizes = [16, 32], strides = [1, 1]} : vector<16x128xf32> to vector<16x32xf32>
    %34 = vector.extract_strided_slice %15 {offsets = [0, 32], sizes = [16, 32], strides = [1, 1]} : vector<16x128xf32> to vector<16x32xf32>
    %cst_19 = arith.constant dense<0.000000e+00> : vector<8x16xf32>
    %35 = tpu.matmul %32, %33, %cst_19 {dimension_numbers = #tpu.dot_dimension_numbers<[1], [1], [0], [0], [0, 0, 1, 0], [], []>} : vector<8x32xf32>, vector<16x32xf32>, vector<8x16xf32> -> vector<8x16xf32>
    %cst_20 = arith.constant dense<0xFF800000> : vector<8xf32>
    %36 = vector.multi_reduction <maximumf>, %35, %cst_20 [1] : vector<8x16xf32> to vector<8xf32>
    %37 = vector.shape_cast %36 : vector<8xf32> to vector<8x1xf32>
    %38 = vector.broadcast %37 : vector<8x1xf32> to vector<8x16xf32>
    %39 = arith.subf %35, %38 : vector<8x16xf32>
    %40 = math.exp %39 : vector<8x16xf32>
    %cst_21 = arith.constant dense<0.000000e+00> : vector<8xf32>
    %41 = vector.multi_reduction <add>, %40, %cst_21 [1] : vector<8x16xf32> to vector<8xf32>
    %42 = vector.shape_cast %41 : vector<8xf32> to vector<8x1xf32>
    %cst_22 = arith.constant 1.000000e+00 : f32
    %43 = vector.broadcast %cst_22 : f32 to vector<8x1xf32>
    %44 = arith.divf %43, %42 : vector<8x1xf32>
    %45 = vector.broadcast %44 : vector<8x1xf32> to vector<8x16xf32>
    %46 = arith.mulf %40, %45 : vector<8x16xf32>
    %cst_23 = arith.constant dense<0.000000e+00> : vector<8x32xf32>
    %47 = tpu.matmul %46, %34, %cst_23 {dimension_numbers = #tpu.dot_dimension_numbers<[1], [0], [0], [1], [0, 0, 1, 1], [], []>} : vector<8x16xf32>, vector<16x32xf32>, vector<8x32xf32> -> vector<8x32xf32>
    %48 = vector.extract_strided_slice %8 {offsets = [0, 64], sizes = [8, 32], strides = [1, 1]} : vector<8x128xf32> to vector<8x32xf32>
    %49 = vector.extract_strided_slice %14 {offsets = [0, 64], sizes = [16, 32], strides = [1, 1]} : vector<16x128xf32> to vector<16x32xf32>
    %50 = vector.extract_strided_slice %15 {offsets = [0, 64], sizes = [16, 32], strides = [1, 1]} : vector<16x128xf32> to vector<16x32xf32>
    %cst_24 = arith.constant dense<0.000000e+00> : vector<8x16xf32>
    %51 = tpu.matmul %48, %49, %cst_24 {dimension_numbers = #tpu.dot_dimension_numbers<[1], [1], [0], [0], [0, 0, 1, 0], [], []>} : vector<8x32xf32>, vector<16x32xf32>, vector<8x16xf32> -> vector<8x16xf32>
    %cst_25 = arith.constant dense<0xFF800000> : vector<8xf32>
    %52 = vector.multi_reduction <maximumf>, %51, %cst_25 [1] : vector<8x16xf32> to vector<8xf32>
    %53 = vector.shape_cast %52 : vector<8xf32> to vector<8x1xf32>
    %54 = vector.broadcast %53 : vector<8x1xf32> to vector<8x16xf32>
    %55 = arith.subf %51, %54 : vector<8x16xf32>
    %56 = math.exp %55 : vector<8x16xf32>
    %cst_26 = arith.constant dense<0.000000e+00> : vector<8xf32>
    %57 = vector.multi_reduction <add>, %56, %cst_26 [1] : vector<8x16xf32> to vector<8xf32>
    %58 = vector.shape_cast %57 : vector<8xf32> to vector<8x1xf32>
    %cst_27 = arith.constant 1.000000e+00 : f32
    %59 = vector.broadcast %cst_27 : f32 to vector<8x1xf32>
    %60 = arith.divf %59, %58 : vector<8x1xf32>
    %61 = vector.broadcast %60 : vector<8x1xf32> to vector<8x16xf32>
    %62 = arith.mulf %56, %61 : vector<8x16xf32>
    %cst_28 = arith.constant dense<0.000000e+00> : vector<8x32xf32>
    %63 = tpu.matmul %62, %50, %cst_28 {dimension_numbers = #tpu.dot_dimension_numbers<[1], [0], [0], [1], [0, 0, 1, 1], [], []>} : vector<8x16xf32>, vector<16x32xf32>, vector<8x32xf32> -> vector<8x32xf32>
    %64 = vector.extract_strided_slice %8 {offsets = [0, 96], sizes = [8, 32], strides = [1, 1]} : vector<8x128xf32> to vector<8x32xf32>
    %65 = vector.extract_strided_slice %14 {offsets = [0, 96], sizes = [16, 32], strides = [1, 1]} : vector<16x128xf32> to vector<16x32xf32>
    %66 = vector.extract_strided_slice %15 {offsets = [0, 96], sizes = [16, 32], strides = [1, 1]} : vector<16x128xf32> to vector<16x32xf32>
    %cst_29 = arith.constant dense<0.000000e+00> : vector<8x16xf32>
    %67 = tpu.matmul %64, %65, %cst_29 {dimension_numbers = #tpu.dot_dimension_numbers<[1], [1], [0], [0], [0, 0, 1, 0], [], []>} : vector<8x32xf32>, vector<16x32xf32>, vector<8x16xf32> -> vector<8x16xf32>
    %cst_30 = arith.constant dense<0xFF800000> : vector<8xf32>
    %68 = vector.multi_reduction <maximumf>, %67, %cst_30 [1] : vector<8x16xf32> to vector<8xf32>
    %69 = vector.shape_cast %68 : vector<8xf32> to vector<8x1xf32>
    %70 = vector.broadcast %69 : vector<8x1xf32> to vector<8x16xf32>
    %71 = arith.subf %67, %70 : vector<8x16xf32>
    %72 = math.exp %71 : vector<8x16xf32>
    %cst_31 = arith.constant dense<0.000000e+00> : vector<8xf32>
    %73 = vector.multi_reduction <add>, %72, %cst_31 [1] : vector<8x16xf32> to vector<8xf32>
    %74 = vector.shape_cast %73 : vector<8xf32> to vector<8x1xf32>
    %cst_32 = arith.constant 1.000000e+00 : f32
    %75 = vector.broadcast %cst_32 : f32 to vector<8x1xf32>
    %76 = arith.divf %75, %74 : vector<8x1xf32>
    %77 = vector.broadcast %76 : vector<8x1xf32> to vector<8x16xf32>
    %78 = arith.mulf %72, %77 : vector<8x16xf32>
    %cst_33 = arith.constant dense<0.000000e+00> : vector<8x32xf32>
    %79 = tpu.matmul %78, %66, %cst_33 {dimension_numbers = #tpu.dot_dimension_numbers<[1], [0], [0], [1], [0, 0, 1, 1], [], []>} : vector<8x16xf32>, vector<16x32xf32>, vector<8x32xf32> -> vector<8x32xf32>
    %80 = tpu.concatenate %31, %47, %63, %79 in 1 : vector<8x32xf32>, vector<8x32xf32>, vector<8x32xf32>, vector<8x32xf32> -> vector<8x128xf32>
    %c0_34 = arith.constant 0 : index
    %c0_35 = arith.constant 0 : index
    %81 = vector.load %arg8[%c0_34, %c0_35] : memref<128x128xf32, #tpu.memory_space<vmem>>, vector<128x128xf32>
    %cst_36 = arith.constant dense<0.000000e+00> : vector<8x128xf32>
    %82 = tpu.matmul %80, %81, %cst_36 {dimension_numbers = #tpu.dot_dimension_numbers<[1], [0], [0], [1], [0, 0, 1, 1], [], []>} : vector<8x128xf32>, vector<128x128xf32>, vector<8x128xf32> -> vector<8x128xf32>
    %c0_37 = arith.constant 0 : index
    %c0_38 = arith.constant 0 : index
    %83 = vector.load %arg9[%c0_37, %c0_38] : memref<1x128xf32, #tpu.memory_space<vmem>>, vector<1x128xf32>
    %84 = vector.broadcast %83 : vector<1x128xf32> to vector<8x128xf32>
    %85 = arith.addf %82, %84 : vector<8x128xf32>
    %c0_39 = arith.constant 0 : index
    %c0_40 = arith.constant 0 : index
    %c0_41 = arith.constant 0 : index
    %86 = vector.load %arg10[%c0_39, %c0_40, %c0_41] : memref<1x8x128xf32, #tpu.memory_space<vmem>>, vector<1x8x128xf32>
    %87 = vector.shape_cast %86 : vector<1x8x128xf32> to vector<8x128xf32>
    %88 = vector.shape_cast %85 : vector<8x128xf32> to vector<1x8x128xf32>
    tpu.vector_store %arg10[%c0_39, %c0_40, %c0_41], %88 {strides = array<i32>} : memref<1x8x128xf32, #tpu.memory_space<vmem>>, vector<1x8x128xf32>,
    return
  }
  func.func @transform_0(%arg0: i32, %arg1: i32) -> (i32, i32, i32) {
    %c0_i32 = arith.constant 0 : i32
    %c0_i32_0 = arith.constant 0 : i32
    return %arg0, %arg1, %c0_i32 : i32, i32, i32
  }
  func.func @transform_1(%arg0: i32, %arg1: i32) -> (i32, i32, i32) {
    %c0_i32 = arith.constant 0 : i32
    %c0_i32_0 = arith.constant 0 : i32
    %c0_i32_1 = arith.constant 0 : i32
    return %arg0, %c0_i32, %c0_i32_0 : i32, i32, i32
  }
  func.func @transform_2(%arg0: i32, %arg1: i32) -> (i32, i32) {
    %c0_i32 = arith.constant 0 : i32
    %c0_i32_0 = arith.constant 0 : i32
    %c0_i32_1 = arith.constant 0 : i32
    return %c0_i32, %c0_i32_0 : i32, i32
  }
  func.func @transform_3(%arg0: i32, %arg1: i32) -> (i32, i32) {
    %c0_i32 = arith.constant 0 : i32
    %c0_i32_0 = arith.constant 0 : i32
    %c0_i32_1 = arith.constant 0 : i32
    return %c0_i32, %c0_i32_0 : i32, i32
  }
  func.func @transform_4(%arg0: i32, %arg1: i32) -> (i32, i32) {
    %c0_i32 = arith.constant 0 : i32
    %c0_i32_0 = arith.constant 0 : i32
    %c0_i32_1 = arith.constant 0 : i32
    return %c0_i32, %c0_i32_0 : i32, i32
  }
  func.func @transform_5(%arg0: i32, %arg1: i32) -> (i32, i32) {
    %c0_i32 = arith.constant 0 : i32
    %c0_i32_0 = arith.constant 0 : i32
    %c0_i32_1 = arith.constant 0 : i32
    return %c0_i32, %c0_i32_0 : i32, i32
  }
  func.func @transform_6(%arg0: i32, %arg1: i32) -> (i32, i32) {
    %c0_i32 = arith.constant 0 : i32
    %c0_i32_0 = arith.constant 0 : i32
    %c0_i32_1 = arith.constant 0 : i32
    return %c0_i32, %c0_i32_0 : i32, i32
  }
  func.func @transform_7(%arg0: i32, %arg1: i32) -> (i32, i32) {
    %c0_i32 = arith.constant 0 : i32
    %c0_i32_0 = arith.constant 0 : i32
    %c0_i32_1 = arith.constant 0 : i32
    return %c0_i32, %c0_i32_0 : i32, i32
  }
  func.func @transform_8(%arg0: i32, %arg1: i32) -> (i32, i32, i32) {
    %c0_i32 = arith.constant 0 : i32
    %c0_i32_0 = arith.constant 0 : i32
    return %arg0, %arg1, %c0_i32 : i32, i32, i32
  }
}

</mosaic_0001>

<bundles_post_ra>
// kernel: tpu_custom_call.1
= control target key start
LH: loop header
LB: loop body
LE: loop exit
PB: predicated region body
PF: predicated region fallthrough
CT: control target
= control target key end

     0   :  { %s1866_s0 = inlined_call_operand.hbm [shape: f32[2,8,128], index: 0, kind: input, shape index: {}]   ;;  %s1867_s1 = inlined_call_operand.hbm [shape: f32[2,16,128], index: 1, kind: input, shape index: {}]   ;;  %s1868_s2 = inlined_call_operand.hbm [shape: f32[128,128], index: 2, kind: input, shape index: {}]   ;;  %s1869_s3 = inlined_call_operand.vmem [shape: f32[1,128], index: 3, kind: input, shape index: {}]   ;;  %s1870_s4 = inlined_call_operand.hbm [shape: f32[128,256], index: 4, kind: input, shape index: {}]   ;;  %s1871_s5 = inlined_call_operand.vmem [shape: f32[1,256], index: 5, kind: input, shape index: {}]   ;;  %s1872_s6 = inlined_call_operand.hbm [shape: f32[128,128], index: 6, kind: input, shape index: {}]   ;;  %s1873_s7 = inlined_call_operand.vmem [shape: f32[1,128], index: 7, kind: input, shape index: {}]   ;;  %s1874_s8 = inlined_call_operand.hbm [shape: f32[2,8,128], index: 8, kind: output, shape index: {}]  }
   0x1   :  { %1881 = sst [smem:[#allocation22_spill]] %s1868_s2 }
   0x2   :  { %1882 = sst [smem:[#allocation23_spill]] %s1870_s4 }
   0x3   :  { %1883 = sst [smem:[#allocation24_spill]] %s1872_s6 }
   0x4   :  { %1884 = sst [smem:[#allocation25_spill]] %s1873_s7 }
   0x5   :  { %13 = vsyncpa [#allocation3], 0 }
   0x6   :  { %15 = vsyncpa [#allocation3 + $0x1], 0 }
   0x7   :  { %16 = vsyncpa [#allocation6], 0 }
   0x8   :  { %18 = vsyncpa [#allocation6 + $0x1], 0 }
   0x9   :  { %19 = vsyncpa [#allocation9], 0 }
   0xa   :  { %20 = vsyncpa [#allocation4], 0 }
   0xb   :  { %22 = vsyncpa [#allocation4 + $0x1], 0  ;;  %s1582_s27 = smov 0   ;;  %s1584_s28 = smov 0  }
   0xc   :  { %s1586_s29 = smov 0   ;;  %s1588_s30 = smov 0  }
   0xd   :  { %s1590_s9 = smov 0   ;;  %s1592_s10 = smov 0  }
   0xe LB: > { %1885 = sst [smem:[#allocation17_spill]] %s1505_s27  ;;  %s1613_s11 = sadd.s32 4294967295, %s1525_s10   ;;  %s1525_s10 = sphi %s1592_s10, %s28_s10   ;;  %s1521_s9 = sphi %s1590_s9, %s1912_s9   ;;  %s1517_s30 = sphi %s1588_s30, %s1911_s30   ;;  %s1513_s29 = sphi %s1586_s29, %s1907_s29   ;;  %s1509_s28 = sphi %s1584_s28, %s1910_s28   ;;  %s1505_s27 = sphi %s1582_s27, %s1909_s27  }
   0xf   : > { %1886 = sst [smem:[#allocation18_spill]] %s1513_s29  ;;  %p1105_p0 = scmp.ge.s32.totalorder %s1525_s10, 1 }
  0x10   : > { %p63_p1 = scmp.eq.s32.totalorder %s1613_s11, 0  ;;  %p253_p2 = scmp.lt.s32.totalorder %s1525_s10, 3 }
  0x11   : > { %s1887_s2 = sld [smem:[#allocation22_spill]]  ;;  %s1527_s16 = smov [#allocation7]  }
  0x12   : > { %p1621_p3 = pnand %p1105_p0, %p253_p2  ;;  %s266_s17 = sshll.u32 %s1527_s16, 4  ;;  %s267_s17 = int_to_ptr.vmem [resolvable:$true] %s266_s17 }
  0x13   : > { %p1109_p6 = scmp.ge.s32.totalorder %s1525_s10, 2  ;;  %s1890_s4 = sld [smem:[#allocation23_spill]] }
  0x14   : > { %p1161_p4 = pneg %p1621_p3  ;;  %s1875_s22 = smov 128  }
  0x15   : > { %s1876_s23 = smov 8   ;;  %s1530_s24 = smov [#allocation8]  }
  0x16   : > { %p1629_p5 = pnand %p1161_p4, %p63_p1  ;;  %s283_s25 = sshll.u32 %s1530_s24, 4  ;;  %s284_s25 = int_to_ptr.vmem [resolvable:$true] %s283_s25 }
  0x17   : > { %s264_s14 = sshll.u32 %s1887_s2, 4  ;;  %s1531_s26 = smov 256   ;;  %s265_s14 = int_to_ptr.hbm [resolvable:$true] %s264_s14 }
  0x18   : > { %1164 = dma.hbm_to_vmem [thread:$0]  (!%p1629_p5), %s265_s14, 2048, %s267_s17, [#allocation6], %s1875_s22, %s1875_s22, %s1876_s23  }
  0x19   : > { %s281_s21 = sshll.u32 %s1890_s4, 4  ;;  %s1532_s12 = smov 16   ;;  %s282_s21 = int_to_ptr.hbm [resolvable:$true] %s281_s21 }
  0x1a   : > { %1167 = dma.hbm_to_vmem [thread:$0]  (!%p1629_p5), %s282_s21, 4096, %s284_s25, [#allocation9], %s1531_s26, %s1531_s26, %s1532_s12  }
  0x1b   : > { %s1891_s6 = sld [smem:[#allocation24_spill]]  ;;  %s1533_s14 = smov [#allocation10]  }
  0x1c   : > { %s300_s17 = sshll.u32 %s1533_s14, 4  ;;  %s1104_s20 = sadd.s32 4294967294, %s1525_s10   ;;  %s301_s17 = int_to_ptr.vmem [resolvable:$true] %s300_s17 }
  0x1d   : > { %s40_s21 = sadd.s32 1, %s1521_s9  ;;  %s49_s24 = sadd.s32 1, %s1513_s29 }
  0x1e   : > { %p42_p7 = scmp.ge.s32.totalorder %s40_s21, 2  ;;  %p56_p8 = scmp.ne.s32.totalorder %s1513_s29, %s1509_s28 }
  0x1f   : > { %p57_p9 = scmp.eq.s32.totalorder %s1525_s10, 0  ;;  %p62_p10 = scmp.ne.s32.totalorder %s1509_s28, %s1505_s27 }
  0x20   : > { %s1914_s21 = smov (%p42_p7, %s40_s21), 0  ;;  %p240_p13 = scmp.eq.s32.totalorder %s1613_s11, 1 }
  0x21   : > { %s298_s19 = sshll.u32 %s1891_s6, 4  ;;  %1892 = sst [smem:[#allocation19_spill]] %s1914_s21  ;;  %s299_s19 = int_to_ptr.hbm [resolvable:$true] %s298_s19 }
  0x22   : > { %1170 = dma.hbm_to_vmem [thread:$0]  (!%p1629_p5), %s299_s19, 2048, %s301_s17, [#allocation9], %s1875_s22, %s1875_s22, %s1876_s23  }
  0x23   : > { %p1662_p11 = por %p57_p9, %p56_p8  ;;  %p1668_p12 = por %p63_p1, %p62_p10 }
  0x24   : > { %s44_s26 = ssub.s32 %s1521_s9, %s1914_s21  ;;  %p246_p2 = scmp.eq.s32.totalorder %s1104_s20, 1 }
  0x25   : > { %p47_p0 = scmp.eq.s32.totalorder %s44_s26, 0  ;;  %p1675_p4 = por %p240_p13, %p56_p8 }
  0x26   : > { %p1185_p5 = scmp.lt.s32.totalorder %s1525_s10, 2  ;;  %p1683_p7 = por %p246_p2, %p62_p10 }
  0x27   : > { %s1681_s13 = scalar_select %p47_p0, %s1513_s29, %s49_s24  }
  0x28   : > { %s1897_s16 = scalar_select %p1683_p7, 1, 0 }
  0x29   : > { %1896 = sst [smem:[#allocation20_spill]] %s1681_s13  ;;  %s317_s19 = sand.u32 1, %s1513_s29  }
  0x2a   : > { %1898 = sst [smem:[#allocation21_spill]] %s1897_s16  ;;  %s1110_s14 = sshll.u32 %s317_s19, 3 }
  0x2b   : > { %s1111_s17 = sshll.u32 %s1521_s9, 3  ;;  %s321_s26 = scalar_lea.vmem [#allocation2], %s1110_s14 }
  0x2c   : > { %s326_s20 = scalar_lea.hbm %s1866_s0, %s1111_s17  ;;  %s330_s2 = sshll.u32 %s321_s26, 4  ;;  %s331_s2 = int_to_ptr.vmem [resolvable:$true] %s330_s2 }
  0x2d   : > { %s328_s4 = sshll.u32 %s326_s20, 4  ;;  %p1172_p8 = pnand %p1185_p5, %p1662_p11  ;;  %s329_s4 = int_to_ptr.hbm [resolvable:$true] %s328_s4 }
  0x2e   : > { %s1112_s24 = sshll.u32 %s317_s19, 4  ;;  %s1142_s6 = sshll.u32 %s1521_s9, 4 }
  0x2f   : > { %s318_s21 = scalar_lea.sflag [#allocation3], %s317_s19  ;;  %s341_s13 = scalar_lea.vmem [#allocation5], %s1112_s24 }
  0x30   : > { %1174 = dma.hbm_to_vmem [thread:$0]  (!%p1172_p8), %s329_s4, 128, %s331_s2, %s318_s21  }
  0x31   : > { %s349_s29 = sshll.u32 %s341_s13, 4  ;;  %s337_s16 = sand.u32 1, %s1525_s10   ;;  %s350_s29 = int_to_ptr.vmem [resolvable:$true] %s349_s29 }
  0x32   : > { %s346_s22 = scalar_lea.hbm %s1867_s1, %s1142_s6  ;;  %s338_s14 = scalar_lea.sflag [#allocation6], %s337_s16 }
  0x33   : > { %s347_s23 = sshll.u32 %s346_s22, 4  ;;  %s1899_s17 = smov 8   ;;  %s348_s23 = int_to_ptr.hbm [resolvable:$true] %s347_s23 }
  0x34   : > { %s1900_s20 = smov 128   ;;  %361 = sbr.rel (%p1621_p3) target bundleno = 1434 (0x59a), region = 52 }
  0x35   : > { %1177 = dma.hbm_to_vmem [thread:$0]  (!%p1172_p8), %s348_s23, 256, %s350_s29, %s338_s14, %s1900_s20, %s1900_s20, %s1899_s17  }
  0x36   : > { %s1705_s2 = sand.u32 (!%p1621_p3), 1, %s1509_s28  }
  0x37   : > { %s1116_s4 = sshll.u32 (!%p1621_p3), %s1705_s2, 3  ;;  %s364_s7 = scalar_lea.sflag (!%p1621_p3), [#allocation3], %s1705_s2 }
  0x38   : > { %s1711_s6 = scalar_lea.vmem (!%p1621_p3), [#allocation2], %s1116_s4 }
  0x39   : > { %1484 = dma.done.wait (%p1668_p12), %s364_s7, 128  }
  0x3a   : > { %1486 = vsyncadd (%p1668_p12), %s364_s7, 4294967168  ;;  %s373_s27 = sand.u32 1, %s1613_s11   ;;  %s1117_s29 = sshll.u32 %s1705_s2, 4 }
  0x3b   : > { %s374_s15 = scalar_lea.sflag [#allocation6], %s373_s27  ;;  %s1719_s21 = scalar_lea.vmem [#allocation5], %s1117_s29 }
  0x3c   : > { %1488 = dma.done.wait (%p1668_p12), %s374_s15, 256  }
  0x3d   : > { %1490 = vsyncadd (%p1668_p12), %s374_s15, 4294967040 }
  0x3e   : > { %1492 = dma.done.wait (%p63_p1), [#allocation6], 2048  }
  0x3f   : > { %1494 = vsyncadd (%p63_p1), [#allocation6], 4294965248 }
  0x40   : > { %1496 = dma.done.wait (%p63_p1), [#allocation9], 6144  }
  0x41   : > { %1498 = vsyncadd (%p63_p1), [#allocation9], 4294961152  ;;  %v449_v0 = vld [vmem:[#allocation7 + $0x78] sm:$0xff]  ;;  %v504_v1 = vld [vmem:[#allocation8 + $0xf0] sm:$0xff]  ;;  %s1534_s25 = smov 96   ;;  %vm558_vm0 = vcmask 261120  }
  0x42   : > { %v448_v2 = vld [vmem:[#allocation7 + $0x70] sm:$0xff]  ;;  %454 = vmatpush.msra.mxu0 %v449_v0  ;;  %512 = vmatpush.msra.mxu1 %v504_v1  ;;  %v502_v3 = vld [vmem:[#allocation8 + $0xe0] sm:$0xff]  ;;  %v447_v4 = vld [vmem:[#allocation7 + $0x68] sm:$0xff]  ;;  %s1535_s19 = smov 64   ;;  %s1536_s26 = smov 32   ;;  %vm588_vm1 = vcmask 130048  }
  0x43   : > { %v500_v5 = vld [vmem:[#allocation8 + $0xd0] sm:$0xff]  ;;  %v446_v6 = vld [vmem:[#allocation7 + $0x60] sm:$0xff]  ;;  %v445_v8 = vld [vmem:[#allocation7 + $0x58] sm:$0xff]  ;;  %s1139_s24 = sshll.u32 %s1517_s30, 3  ;;  %s1903_s7 = sld [smem:[#allocation25_spill]] }
  0x44   : > { %455 = vmatpush.msra.mxu0 %v448_v2  ;;  %513 = vmatpush.msra.mxu1 %v502_v3  ;;  %v498_v7 = vld [vmem:[#allocation8 + $0xc0] sm:$0xff]  ;;  %v496_v9 = vld [vmem:[#allocation8 + $0xb0] sm:$0xff]  ;;  %v443_v12 = vld [vmem:[#allocation7 + $0x48] sm:$0xff]  ;;  %s967_s14 = scalar_lea.hbm %s1874_s8, %s1139_s24  ;;  %s956_s15 = scalar_lea.sflag [#allocation4], %s1705_s2 }
  0x45   : > { %v444_v10 = vld [vmem:[#allocation7 + $0x50] sm:$0xff]  ;;  %v494_v11 = vld [vmem:[#allocation8 + $0xa0] sm:$0xff]  ;;  %v505_v14 = vld [vmem:[#allocation8 + $0xf8] sm:$0xff]  ;;  %s971_s29 = sshll.u32 %s967_s14, 4  ;;  %s972_s29 = int_to_ptr.hbm [resolvable:$true] %s971_s29 }
  0x46   : > { %456 = vmatpush.msra.mxu0 %v447_v4  ;;  %514 = vmatpush.msra.mxu1 %v500_v5  ;;  %v492_v13 = vld [vmem:[#allocation8 + $0x90] sm:$0xff]  ;;  %v442_v15 = vld [vmem:[#allocation7 + $0x40] sm:$0xff]  ;;  %v503_v17 = vld [vmem:[#allocation8 + $0xe8] sm:$0xff]  ;;  %s1445_s30 = sshra.s32 %s972_s29, 4  ;;  %s1446_s30 = int_to_ptr.hbm [resolvable:$true] %s1445_s30 }
  0x47   : > { %v490_v16 = vld [vmem:[#allocation8 + $0x80] sm:$0xff]  ;;  %535 = vmatpush.msra.mxu2 %v505_v14  ;;  %v501_v18 = vld [vmem:[#allocation8 + $0xd8] sm:$0xff]  ;;  %v488_v20 = vld [vmem:[#allocation8 + $0x70] sm:$0xff]  ;;  %p1452_p10 = scmp.lt.s32.totalorder %s1446_s30, %s1874_s8 }
  0x48   : > { %457 = vmatpush.msra.mxu0 %v446_v6  ;;  %515 = vmatpush.msra.mxu1 %v498_v7  ;;  %v441_v19 = vld [vmem:[#allocation7 + $0x38] sm:$0xff]  ;;  %v499_v21 = vld [vmem:[#allocation8 + $0xc8] sm:$0xff]  ;;  %v440_v22 = vld [vmem:[#allocation7 + $0x30] sm:$0xff] }
  0x49   : > { %536 = vmatpush.msra.mxu2 %v503_v17  ;;  %v486_v23 = vld [vmem:[#allocation8 + $0x60] sm:$0xff]  ;;  %v497_v24 = vld [vmem:[#allocation8 + $0xb8] sm:$0xff]  ;;  %v439_v25 = vld [vmem:[#allocation7 + $0x28] sm:$0xff] }
  0x4a   : > { %458 = vmatpush.msra.mxu0 %v445_v8  ;;  %516 = vmatpush.msra.mxu1 %v496_v9  ;;  %v484_v26 = vld [vmem:[#allocation8 + $0x50] sm:$0xff]  ;;  %v495_v27 = vld [vmem:[#allocation8 + $0xa8] sm:$0xff]  ;;  %v438_v28 = vld [vmem:[#allocation7 + $0x20] sm:$0xff] }
  0x4b   : > { %537 = vmatpush.msra.mxu2 %v501_v18  ;;  %v482_v29 = vld [vmem:[#allocation8 + $0x40] sm:$0xff]  ;;  %v493_v30 = vld [vmem:[#allocation8 + $0x98] sm:$0xff]  ;;  %v480_v32 = vld [vmem:[#allocation8 + $0x30] sm:$0xff] }
  0x4c   : > { %459 = vmatpush.msra.mxu0 %v444_v10  ;;  %517 = vmatpush.msra.mxu1 %v494_v11  ;;  %v437_v31 = vld [vmem:[#allocation7 + $0x18] sm:$0xff]  ;;  %v491_v33 = vld [vmem:[#allocation8 + $0x88] sm:$0xff]  ;;  %v436_v34 = vld [vmem:[#allocation7 + $0x10] sm:$0xff] }
  0x4d   : > { %538 = vmatpush.msra.mxu2 %v499_v21  ;;  %v478_v35 = vld [vmem:[#allocation8 + $0x20] sm:$0xff]  ;;  %v489_v36 = vld [vmem:[#allocation8 + $0x78] sm:$0xff]  ;;  %v435_v37 = vld [vmem:[#allocation7 + $0x8] sm:$0xff] }
  0x4e   : > { %460 = vmatpush.msra.mxu0 %v443_v12  ;;  %518 = vmatpush.msra.mxu1 %v492_v13  ;;  %v476_v38 = vld [vmem:[#allocation8 + $0x10] sm:$0xff]  ;;  %v487_v39 = vld [vmem:[#allocation8 + $0x68] sm:$0xff]  ;;  %v434_v40 = vld [vmem:[#allocation7] sm:$0xff] }
  0x4f   : > { %539 = vmatpush.msra.mxu2 %v497_v24  ;;  %v474_v41 = vld [vmem:[#allocation8] sm:$0xff]  ;;  %v431_v42 = vld [vmem:[%s1711_s6] sm:$0xff]  ;;  %v483_v45 = vld [vmem:[#allocation8 + $0x48] sm:$0xff]  ;;  %s430_s6 = scalar_lea.vmem [#allocation11], %s1116_s4 }
  0x50   : > { %461 = vmatpush.msra.mxu0 %v442_v15  ;;  %519 = vmatpush.msra.mxu1 %v490_v16  ;;  %v432_v43 = vld [vmem:[%s1719_s21] sm:$0xff]  ;;  %v485_v44 = vld [vmem:[#allocation8 + $0x58] sm:$0xff]  ;;  %v479_v47 = vld [vmem:[#allocation8 + $0x28] sm:$0xff]  ;;  %s969_s27 = sshll.u32 %s430_s6, 4  ;;  %s970_s27 = int_to_ptr.vmem [resolvable:$true] %s969_s27 }
  0x51   : > { %540 = vmatpush.msra.mxu2 %v495_v27  ;;  %v481_v46 = vld [vmem:[#allocation8 + $0x38] sm:$0xff]  ;;  %v475_v50 = vld [vmem:[#allocation8 + $0x8] sm:$0xff]  ;;  %v1263_v51 = vld [vmem:[%s1869_s3] ss:$0 sm:$0xff] }
  0x52   : > { %462 = vmatpush.msra.mxu0 %v441_v19  ;;  %520 = vmatpush.msra.mxu1 %v488_v20  ;;  %v433_v48 = vld [vmem:[%s1719_s21 + $0x8] sm:$0xff]  ;;  %v506_v55 = vld [vmem:[%s1871_s5] sm:$0x3]  ;;  %s1447_s21 = scalar_lea.hbm %s1446_s30, 8 }
  0x53   : > { %541 = vmatpush.msra.mxu2 %v493_v30  ;;  %v477_v49 = vld [vmem:[#allocation8 + $0x18] sm:$0xff]  ;;  %v508_v56 = vperm.slane %v506_v55, 0  ;;  %v509_v61 = vperm.slane %v506_v55, 1  ;;  %p1448_p1 = scmp.ne.s32.totalorder %s1446_s30, %s1447_s21 }
  0x54   : > { %463 = vmatpush.msra.mxu0 %v440_v22  ;;  %521 = vmatpush.msra.mxu1 %v486_v23 }
  0x55   : > { %542 = vmatpush.msra.mxu2 %v491_v33  ;;  %p1449_p3 = pnand %p1448_p1, %p1675_p4 }
  0x56   : > { %464 = vmatpush.msra.mxu0 %v439_v25  ;;  %522 = vmatpush.msra.mxu1 %v484_v26 }
  0x57   : > { %543 = vmatpush.msra.mxu2 %v489_v36  ;;  %p1450_p9 = pneg %p1449_p3 }
  0x58   : > { %465 = vmatpush.msra.mxu0 %v438_v28  ;;  %523 = vmatpush.msra.mxu1 %v482_v29 }
  0x59   : > { %544 = vmatpush.msra.mxu2 %v487_v39 }
  0x5a   : > { %466 = vmatpush.msra.mxu0 %v437_v31  ;;  %524 = vmatpush.msra.mxu1 %v480_v32 }
  0x5b   : > { %545 = vmatpush.msra.mxu2 %v485_v44 }
  0x5c   : > { %467 = vmatpush.msra.mxu0 %v436_v34  ;;  %525 = vmatpush.msra.mxu1 %v478_v35 }
  0x5d   : > { %546 = vmatpush.msra.mxu2 %v483_v45 }
  0x5e   : > { %468 = vmatpush.msra.mxu0 %v435_v37  ;;  %526 = vmatpush.msra.mxu1 %v476_v38 }
  0x5f   : > { %547 = vmatpush.msra.mxu2 %v481_v46 }
  0x60   : > { %469 = vmatpush.msra.mxu0 %v434_v40  ;;  %527 = vmatpush.msra.mxu1 %v474_v41 }
  0x61   : > { %470 = vmatmul.f32.vlgmr.msra.gmra.mxu0 %v431_v42  ;;  %528 = vmatmul.f32.vlgmr.msra.gmra.mxu1 %v432_v43 }
  0x62   : > { %548 = vmatpush.msra.mxu2 %v479_v47 }
  0x64   : > { %549 = vmatpush.msra.mxu2 %v477_v49 }
  0x66   : > { %550 = vmatpush.msra.mxu2 %v475_v50 }
  0x67   : > { %551 = vmatmul.f32.vlgmr.msra.gmra.mxu2 %v432_v43 }
  0x69   : > { %531 = vmatmul.f32.gmra.mxu1 %v433_v48 }
  0x6f   : > { %554 = vmatmul.f32.gmra.mxu2 %v433_v48 }
  0xde   : > { %v471_v52 = vpop.f32.mrf.mxu0  ;;  %v529_v53 = vpop.f32.mrf.mxu1 }
  0xdf   : > { %v472_v54 = vadd.f32 %v1263_v51, %v471_v52  ;;  %v530_v59 = vadd.f32 %v529_v53, %v508_v56 }
  0xe1   : > { %637 = vrot.lane.b32.xlu2 %v472_v54, %s1534_s25 }
  0xe6   : > { %v532_v57 = vpop.f32.mrf.mxu1 }
  0xe7   : > { %v533_v58 = vadd.f32 %v532_v57, %v508_v56 }
  0xe9   : > { %641 = vrot.lane.b32.xlu1 %v533_v58, %s1534_s25  ;;  %1122 = vmatpush.xpose.msk.msra.mxu3 %vm558_vm0, %v533_v58 }
  0xea   : > { %729 = vrot.lane.b32.xlu2 %v533_v58, %s1535_s19  ;;  %v552_v60 = vpop.f32.mrf.mxu2 }
  0xeb   : > { %v1753_v63 = vadd.f32 %v552_v60, %v509_v61 }
  0xed   : > { %1123 = vmatpush.xpose.msk.msra.mxu3 %vm558_vm0, %v530_v59 }
  0xf0   : > { %1124 = vmatmul.msk.f32.vlgmr.msra.gmra.mxu3 %vm558_vm0, %v472_v54 }
  0xf1   : > { %639 = vrot.lane.b32.xlu1 %v530_v59, %s1534_s25 }
  0xf2   : > { %815 = vrot.lane.b32.xlu2 %v533_v58, %s1536_s26  ;;  %v555_v62 = vpop.f32.mrf.mxu2 }
  0xf3   : > { %v1755_v0 = vadd.f32 %v555_v62, %v509_v61 }
  0xf5   : > { %631 = vmatpush.msrb.mxu3 %v1755_v0  ;;  %v1253_v51 = vpack.i.bf16 %v1753_v63, %v1755_v0 }
  0xf7   : > { %632 = vmatpush.msrb.mxu3 %v1753_v63 }
  0xf9   : > { %725 = vrot.lane.b32.xlu1 %v472_v54, %s1535_s19 }
  0xfa   : > { %811 = vrot.lane.b32.xlu2 %v472_v54, %s1536_s26 }
 0x101   : > { %813 = vrot.lane.b32.xlu1 %v530_v59, %s1536_s26 }
 0x13b   : > { %v638_v1 = vpop.permute.xlu2 %637 }
 0x144   : > { %v730_v2 = vpop.permute.xlu2 %729 }
 0x145   : > { %1130 = vmatpush.xpose.msk.msrb.mxu0 %vm558_vm0, %v730_v2 }
 0x14c   : > { %v816_v26 = vpop.permute.xlu2 %815 }
 0x154   : > { %v812_v28 = vpop.permute.xlu2 %811 }
 0x15b   : > { %v642_v3 = vpop.permute.xlu1 %641 }
 0x15c   : > { %1126 = vmatpush.xpose.msk.msra.mxu3 %vm558_vm0, %v642_v3 }
 0x163   : > { %v640_v4 = vpop.permute.xlu1 %639 }
 0x164   : > { %1127 = vmatpush.xpose.msk.msra.mxu3 %vm558_vm0, %v640_v4 }
 0x16b   : > { %v726_v19 = vpop.permute.xlu1 %725 }
 0x173   : > { %v585_v5 = vpop.f32.mrf.mxu3  ;;  %v814_v27 = vpop.permute.xlu1 %813 }
 0x174   : > { %v589_v6 = vsel %vm588_vm1, %v585_v5, -inf }
 0x175   : > { %590 = vmax.xlane.f32.xlu0 %v589_v6 }
 0x1e8   : > { %v591_v7 = vpop.xlane.xlu0 %590 }
 0x1e9   : > { %v592_v8 = vsub.f32 %v585_v5, %v591_v7 }
 0x1eb   : > { %v593_v9 = vmul.f32 1.442695, %v592_v8 }
 0x1ed   : > { %1265 = vpow2.f32 %v593_v9 }
 0x1f3   : > { %v1266_v10 = vpop.eup %1265 }
 0x1f4   : > { %v595_v11 = vsel %vm588_vm1, %v1266_v10, 0.0 }
 0x1f5   : > { %596 = vadd.xlane.f32.xlu0 %v595_v11 }
 0x209   : > { %727 = vrot.lane.b32.xlu0 %v530_v59, %s1535_s19 }
 0x268   : > { %v597_v12 = vpop.xlane.xlu0 %596 }
 0x269   : > { %1267 = vrcp.f32 %v597_v12  ;;  %v609_v16 = vand.u32 2147483648, %v597_v12  ;;  %v607_v18 = vand.u32 2147483647, %v597_v12  ;;  %vm603_vm3 = vweird.f32 %v597_v12 }
 0x26b   : > { %v610_v21 = vor.u32 1.1754944e-38, %v609_v16  ;;  %vm608_vm5 = vcmp.eq.f32.partialorder %v607_v18, 8.507059e+37 }
 0x26f   : > { %v1268_v13 = vpop.eup %1267 }
 0x270   : > { %v599_v14 = vmul.f32 %v1268_v13, %v597_v12  ;;  %vm604_vm2 = vweird.f32 %v1268_v13 }
 0x271   : > { %vm605_vm4 = vmor %vm603_vm3, %vm604_vm2 }
 0x272   : > { %v600_v15 = vsub.f32 1.0, %v599_v14 }
 0x274   : > { %v601_v17 = vmul.f32 %v1268_v13, %v600_v15 }
 0x276   : > { %v602_v20 = vadd.f32 %v1268_v13, %v601_v17 }
 0x278   : > { %v606_v22 = vsel %vm605_vm4, %v1268_v13, %v602_v20  ;;  %vm912_vm4 = vcmask 785408  }
 0x279   : > { %v611_v23 = vsel %vm608_vm5, %v610_v21, %v606_v22 }
 0x27a   : > { %v613_v24 = vmul.f32 %v1266_v10, %v611_v23 }
 0x27b   : > { %v728_v25 = vpop.permute.xlu0 %727 }
 0x27c   : > { %1125 = vmatmul.msk.f32.vlgmr.msrb.gmra.mxu3 %vm588_vm1, %v613_v24  ;;  %1131 = vmatpush.xpose.msk.msrb.mxu0 %vm558_vm0, %v728_v25 }
 0x27f   : > { %1132 = vmatmul.msk.f32.vlgmr.msrb.gmra.mxu0 %vm558_vm0, %v726_v19 }
 0x280   : > { %1134 = vmatpush.xpose.msk.msra.mxu0 %vm558_vm0, %v816_v26 }
 0x284   : > { %1135 = vmatpush.xpose.msk.msra.mxu0 %vm558_vm0, %v814_v27  ;;  %1128 = vmatmul.msk.f32.vlgmr.msra.gmra.mxu3 %vm558_vm0, %v638_v1 }
 0x287   : > { %1136 = vmatmul.msk.f32.vlgmr.msra.gmra.mxu0 %vm558_vm0, %v812_v28 }
 0x2fc   : > { %v754_v29 = vpop.f32.mrf.mxu0 }
 0x2fd   : > { %v757_v30 = vsel %vm588_vm1, %v754_v29, -inf }
 0x2fe   : > { %758 = vmax.xlane.f32.xlu2 %v757_v30 }
 0x2ff   : > { %v1773_v31 = vpop.f32.mrf.mxu3 }
 0x304   : > { %v840_v32 = vpop.f32.mrf.mxu0 }
 0x305   : > { %v843_v33 = vsel %vm588_vm1, %v840_v32, -inf }
 0x306   : > { %844 = vmax.xlane.f32.xlu0 %v843_v33 }
 0x307   : > { %v666_v34 = vpop.f32.mrf.mxu3 }
 0x308   : > { %v669_v35 = vsel %vm588_vm1, %v666_v34, -inf }
 0x309   : > { %670 = vmax.xlane.f32.xlu1 %v669_v35 }
 0x371   : > { %v759_v36 = vpop.xlane.xlu2 %758 }
 0x372   : > { %v760_v37 = vsub.f32 %v754_v29, %v759_v36 }
 0x374   : > { %v761_v38 = vmul.f32 1.442695, %v760_v37 }
 0x376   : > { %1269 = vpow2.f32 %v761_v38  ;;  %v929_v38 = vld [vmem:[#allocation10 + $0x78] sm:$0xff] }
 0x377   : > { %934 = vmatpush.msrb.mxu2 %v929_v38 }
 0x379   : > { %v845_v39 = vpop.xlane.xlu0 %844 }
 0x37a   : > { %v846_v40 = vsub.f32 %v840_v32, %v845_v39  ;;  %v928_v39 = vld [vmem:[#allocation10 + $0x70] sm:$0xff] }
 0x37b   : > { %935 = vmatpush.msrb.mxu2 %v928_v39 }
 0x37c   : > { %v1777_v41 = vpop.eup %1269  ;;  %v847_v42 = vmul.f32 1.442695, %v846_v40  ;;  %v671_v43 = vpop.xlane.xlu1 %670  ;;  %v927_v40 = vld [vmem:[#allocation10 + $0x68] sm:$0xff] }
 0x37d   : > { %v672_v44 = vsub.f32 %v666_v34, %v671_v43  ;;  %v763_v45 = vsel %vm588_vm1, %v1777_v41, 0.0  ;;  %936 = vmatpush.msrb.mxu2 %v927_v40  ;;  %v925_v43 = vld [vmem:[#allocation10 + $0x58] sm:$0xff] }
 0x37e   : > { %1271 = vpow2.f32 %v847_v42  ;;  %764 = vadd.xlane.f32.xlu1 %v763_v45  ;;  %v926_v42 = vld [vmem:[#allocation10 + $0x60] sm:$0xff] }
 0x37f   : > { %v673_v46 = vmul.f32 1.442695, %v672_v44  ;;  %937 = vmatpush.msrb.mxu2 %v926_v42  ;;  %v923_v44 = vld [vmem:[#allocation10 + $0x48] sm:$0xff]  ;;  %v922_v45 = vld [vmem:[#allocation10 + $0x40] sm:$0xff] }
 0x381   : > { %1273 = vpow2.f32 %v673_v46  ;;  %938 = vmatpush.msrb.mxu2 %v925_v43  ;;  %v921_v46 = vld [vmem:[#allocation10 + $0x38] sm:$0xff] }
 0x384   : > { %v1781_v47 = vpop.eup %1271 }
 0x385   : > { %v849_v48 = vsel %vm588_vm1, %v1781_v47, 0.0 }
 0x386   : > { %850 = vadd.xlane.f32.xlu0 %v849_v48  ;;  %v919_v48 = vld [vmem:[#allocation10 + $0x28] sm:$0xff] }
 0x387   : > { %v1274_v49 = vpop.eup %1273 }
 0x388   : > { %v675_v50 = vsel %vm588_vm1, %v1274_v49, 0.0 }
 0x389   : > { %676 = vadd.xlane.f32.xlu2 %v675_v50  ;;  %v917_v50 = vld [vmem:[#allocation10 + $0x18] sm:$0xff] }
 0x397   : > { %1254 = vrot.lane.b32.xlu1 %v1253_v51, %s1535_s19 }
 0x39a   : > { %1259 = vrot.lane.b32.xlu0 %v1253_v51, %s1536_s26 }
 0x3a1   : > { %1249 = vrot.lane.b32.xlu2 %v1253_v51, %s1534_s25  ;;  %v916_v51 = vld [vmem:[#allocation10 + $0x10] sm:$0xff] }
 0x3f1   : > { %v1791_v52 = vpop.xlane.xlu1 %764 }
 0x3f2   : > { %1275 = vrcp.f32 %v1791_v52  ;;  %v777_v22 = vand.u32 2147483648, %v1791_v52  ;;  %vm771_vm15 = vweird.f32 %v1791_v52  ;;  %v775_v26 = vand.u32 2147483647, %v1791_v52 }
 0x3f4   : > { %v778_v32 = vor.u32 1.1754944e-38, %v777_v22  ;;  %vm776_vm3 = vcmp.eq.f32.partialorder %v775_v26, 8.507059e+37 }
 0x3f8   : > { %v1794_v55 = vpop.eup %1275 }
 0x3f9   : > { %v851_v53 = vpop.xlane.xlu0 %850  ;;  %v767_v57 = vmul.f32 %v1794_v55, %v1791_v52  ;;  %vm772_vm11 = vweird.f32 %v1794_v55  ;;  %v915_v52 = vld [vmem:[#allocation10 + $0x8] sm:$0xff] }
 0x3fa   : > { %1277 = vrcp.f32 %v851_v53  ;;  %vm857_vm6 = vweird.f32 %v851_v53  ;;  %v861_v2 = vand.u32 2147483647, %v851_v53  ;;  %v863_v5 = vand.u32 2147483648, %v851_v53  ;;  %vm773_vm2 = vmor %vm771_vm15, %vm772_vm11 }
 0x3fb   : > { %v768_v61 = vsub.f32 1.0, %v767_v57 }
 0x3fc   : > { %v677_v54 = vpop.xlane.xlu2 %676  ;;  %vm862_vm12 = vcmp.eq.f32.partialorder %v861_v2, 8.507059e+37  ;;  %v864_v16 = vor.u32 1.1754944e-38, %v863_v5 }
 0x3fd   : > { %1279 = vrcp.f32 %v677_v54  ;;  %v689_v6 = vand.u32 2147483648, %v677_v54  ;;  %v769_v8 = vmul.f32 %v1794_v55, %v768_v61  ;;  %v687_v10 = vand.u32 2147483647, %v677_v54 }
 0x3fe   : > { %vm683_vm10 = vweird.f32 %v677_v54 }
 0x3ff   : > { %v690_v17 = vor.u32 1.1754944e-38, %v689_v6  ;;  %v770_v18 = vadd.f32 %v1794_v55, %v769_v8  ;;  %vm688_vm14 = vcmp.eq.f32.partialorder %v687_v10, 8.507059e+37 }
 0x400   : > { %v1278_v56 = vpop.eup %1277 }
 0x401   : > { %v853_v58 = vmul.f32 %v1278_v56, %v851_v53  ;;  %vm858_vm7 = vweird.f32 %v1278_v56  ;;  %v774_v29 = vsel %vm773_vm2, %v1794_v55, %v770_v18  ;;  %v914_v53 = vld [vmem:[#allocation10] sm:$0xff] }
 0x402   : > { %vm1799_vm9 = vmor %vm857_vm6, %vm858_vm7  ;;  %v779_v33 = vsel %vm776_vm3, %v778_v32, %v774_v29 }
 0x403   : > { %v1280_v59 = vpop.eup %1279  ;;  %v854_v60 = vsub.f32 1.0, %v853_v58  ;;  %v781_v34 = vmul.f32 %v1777_v41, %v779_v33  ;;  %v924_v41 = vld [vmem:[#allocation10 + $0x50] sm:$0xff] }
 0x404   : > { %v679_v62 = vmul.f32 %v1280_v59, %v677_v54  ;;  %v1250_v63 = vpop.permute.xlu2 %1249  ;;  %vm684_vm8 = vweird.f32 %v1280_v59  ;;  %939 = vmatpush.msrb.mxu2 %v924_v41 }
 0x405   : > { %v855_v0 = vmul.f32 %v1278_v56, %v854_v60  ;;  %v1251_v1 = vunpack.i.l.bf16 %v1250_v63  ;;  %v1252_v7 = vunpack.i.h.bf16 %v1250_v63  ;;  %vm685_vm13 = vmor %vm683_vm10, %vm684_vm8  ;;  %v1264_v60 = vld [vmem:[%s1903_s7] ss:$0 sm:$0xff] }
 0x406   : > { %v680_v3 = vsub.f32 1.0, %v679_v62  ;;  %940 = vmatpush.msrb.mxu2 %v923_v44 }
 0x407   : > { %v856_v4 = vadd.f32 %v1278_v56, %v855_v0  ;;  %719 = vmatpush.msrb.mxu3 %v1251_v1 }
 0x408   : > { %v681_v9 = vmul.f32 %v1280_v59, %v680_v3  ;;  %941 = vmatpush.msrb.mxu2 %v922_v45 }
 0x409   : > { %v1255_v12 = vpop.permute.xlu1 %1254  ;;  %720 = vmatpush.msrb.mxu3 %v1252_v7  ;;  %v860_v15 = vsel %vm1799_vm9, %v1278_v56, %v856_v4 }
 0x40a   : > { %v682_v13 = vadd.f32 %v1280_v59, %v681_v9  ;;  %v1256_v14 = vunpack.i.l.bf16 %v1255_v12  ;;  %v1257_v20 = vunpack.i.h.bf16 %v1255_v12  ;;  %v865_v25 = vsel %vm862_vm12, %v864_v16, %v860_v15  ;;  %942 = vmatpush.msrb.mxu2 %v921_v46 }
 0x40b   : > { %v867_v30 = vmul.f32 %v1781_v47, %v865_v25  ;;  %v920_v47 = vld [vmem:[#allocation10 + $0x30] sm:$0xff] }
 0x40c   : > { %v686_v19 = vsel %vm685_vm13, %v1280_v59, %v682_v13  ;;  %v1260_v21 = vpop.permute.xlu0 %1259  ;;  %805 = vmatpush.msra.mxu3 %v1256_v14  ;;  %943 = vmatpush.msrb.mxu2 %v920_v47 }
 0x40d   : > { %v691_v23 = vsel %vm688_vm14, %v690_v17, %v686_v19  ;;  %v1261_v24 = vunpack.i.l.bf16 %v1260_v21  ;;  %v1262_v28 = vunpack.i.h.bf16 %v1260_v21 }
 0x40e   : > { %806 = vmatpush.msra.mxu3 %v1257_v20  ;;  %v693_v27 = vmul.f32 %v1274_v49, %v691_v23  ;;  %v918_v49 = vld [vmem:[#allocation10 + $0x20] sm:$0xff]  ;;  %944 = vmatpush.msrb.mxu2 %v919_v48 }
 0x40f   : > { %891 = vmatpush.msrb.mxu1 %v1261_v24 }
 0x410   : > { %1129 = vmatmul.msk.f32.vlgmr.msrb.gmra.mxu3 %vm588_vm1, %v693_v27  ;;  %945 = vmatpush.msrb.mxu2 %v918_v49 }
 0x411   : > { %892 = vmatpush.msrb.mxu1 %v1262_v28 }
 0x412   : > { %1137 = vmatmul.msk.f32.vlgmr.msrb.gmra.mxu1 %vm588_vm1, %v867_v30  ;;  %946 = vmatpush.msrb.mxu2 %v917_v50 }
 0x414   : > { %947 = vmatpush.msrb.mxu2 %v916_v51 }
 0x416   : > { %948 = vmatpush.msrb.mxu2 %v915_v52 }
 0x418   : > { %1133 = vmatmul.msk.f32.vlgmr.msra.gmra.mxu3 %vm588_vm1, %v781_v34  ;;  %949 = vmatpush.msrb.mxu2 %v914_v53  ;;  %vm910_vm1 = vcmask 523264  }
 0x48f   : > { %v894_v35 = vpop.f32.mrf.mxu1 }
 0x490   : > { %906 = vrot.lane.b32.xlu1 %v894_v35, %s1534_s25  ;;  %s1451_s25 = scalar_lea.hbm %s1874_s8, 16 }
 0x491   : > { %p1453_p11 = scmp.lt.s32.totalorder %s1451_s25, %s1447_s21 }
 0x493   : > { %v722_v36 = vpop.f32.mrf.mxu3  ;;  %p1454_p12 = por %p1453_p11, %p1452_p10 }
 0x494   : > { %898 = vrot.lane.b32.xlu2 %v722_v36, %s1536_s26 }
 0x495   : > { %p1455_p13 = pnand %p1454_p12, %p1450_p9 }
 0x49b   : > { %v808_v37 = vpop.f32.mrf.mxu3 }
 0x49c   : > { %902 = vrot.lane.b32.xlu0 %v808_v37, %s1535_s19 }
 0x4ee   : > { %v899_v54 = vpop.permute.xlu2 %898 }
 0x4ef   : > { %v909_v55 = vsel %vm558_vm0, %v1773_v31, %v899_v54 }
 0x502   : > { %v907_v57 = vpop.permute.xlu1 %906 }
 0x50e   : > { %v903_v56 = vpop.permute.xlu0 %902 }
 0x50f   : > { %v911_v58 = vsel %vm910_vm1, %v909_v55, %v903_v56 }
 0x510   : > { %v913_v59 = vsel %vm912_vm4, %v911_v58, %v907_v57 }
 0x511   : > { %950 = vmatmul.f32.vlgmr.msrb.gmra.mxu2 %v913_v59 }
 0x594   : > { %v951_v31 = vpop.f32.mrf.mxu2 }
 0x595   : > { %v952_v61 = vadd.f32 %v1264_v60, %v951_v31 }
 0x597   : > { %954 = vst [vmem:[%s430_s6] sm:$0xff] %v952_v61 }
 0x598   : > { %1458 = shalt.err (!%p1455_p13)
}
 0x599   : > { %1159 = dma.vmem_to_hbm [thread:$0]  (%p1675_p4), %s970_s27, 128, %s972_s29, %s956_s15  }
 0x59a PF: > { %s1904_s2 = sld [smem:[#allocation17_spill]]  ;;  %p1179_p0 = pnand %p1109_p6, %p1683_p7 }
 0x59c   : > { %p1180_p2 = pneg %p1179_p0 }
 0x5a0   : > { %s983_s19 = sand.u32 1, %s1904_s2  }
 0x5a1   : > { %s984_s26 = scalar_lea.sflag [#allocation4], %s983_s19 }
 0x5a2   : > { %1500 = dma.done.wait (%p1180_p2), %s984_s26, 128  }
 0x5a3   : > { %1502 = vsyncadd (%p1180_p2), %s984_s26, 4294967168  ;;  %s28_s10 = sadd.s32 1, %s1525_s10   ;;  %s1906_s24 = sld [smem:[#allocation18_spill]] }
 0x5a4   : > { %p25_p5 = scmp.ge.s32.totalorder %s28_s10, 4   ;;  %s1907_s29 = sld [smem:[#allocation20_spill]] }
 0x5a5   : > { %s1908_s12 = sld [smem:[#allocation19_spill]]  ;;  %s1909_s27 = smov %s1509_s28 }
 0x5a6   : > { %s1911_s30 = smov %s1521_s9 }
 0x5a7   :  { %27 = sbr.rel (!%p25_p5) target bundleno = 14 (0xe), region = 122 }
 0x5a9   : > { %s1910_s28 = smov %s1906_s24 }
 0x5ab   : > { %s1912_s9 = smov %s1908_s12 }
 0x5ac   :  { %990 = vsyncpa [#allocation3], 1 }
 0x5ad   :  { %992 = vsyncpa [#allocation3 + $0x1], 1 }
 0x5ae   :  { %993 = vsyncpa [#allocation6], 1 }
 0x5af   :  { %995 = vsyncpa [#allocation6 + $0x1], 1 }
 0x5b0   :  { %996 = vsyncpa [#allocation9], 1 }
 0x5b1   :  { %997 = vsyncpa [#allocation4], 1 }
 0x5b2   :  { %999 = vsyncpa [#allocation4 + $0x1], 1 }

</bundles_post_ra>
